<compile_context>
chip_gen: v7x
topology: tpu7x:2x2x1
jax: 0.10.0
libtpu: 0.0.40
codegen_flags: <defaults>
</compile_context>

<pallas_src>
import functools

import jax
import jax.numpy as jnp
from jax.experimental import pallas as pl
from jax.experimental.pallas import tpu as pltpu


def _round_up(x, m):
    return (x + m - 1) // m * m


def _residual_block_kernel(
    xs_ref,     # (K*C_res, t_tile)         pre-shifted taps, input dtype (f32)
    wfg_ref,    # (2*C_dil, K*C_res)        fused filter+gate weights (compute dtype)
    bfg_ref,    # (2*C_dil, 1)              fused filter+gate bias (f32)
    wrs_ref,    # (C_res+C_skip, C_dil)     fused residual+skip 1x1 weights
    brs_ref,    # (C_res+C_skip, 1)         fused residual+skip bias (f32)
    xout_ref,   # (C_res, t_tile)           out dtype
    skip_ref,   # (C_skip, t_tile)          out dtype
    *,
    skip_lo: int,     # first (un-padded) output column needed for skip
    use_bias: bool,
):
    ti = pl.program_id(1)
    t_tile = xs_ref.shape[-1]
    c_res = xout_ref.shape[0]
    c_dil = wfg_ref.shape[0] // 2
    kc_res = xs_ref.shape[0]              # K * C_res

    x_stk = xs_ref[...]                   # (K*C_res, t_tile), f32
    x_mm = x_stk.astype(wfg_ref.dtype)

    # Fused filter+gate dilated conv: single MXU matmul (taps folded into the
    # contraction dim).  Accumulate in f32.
    fg = jnp.dot(wfg_ref[...], x_mm, preferred_element_type=jnp.float32)
    if use_bias:
        fg = fg + bfg_ref[...]

    f = fg[:c_dil, :]
    g = fg[c_dil:, :]
    # sigmoid(g) == 0.5*(1 + tanh(0.5*g)): one EUP op; mul/add ride idle VPU slots.
    # TODO(synk): on v6e/v7x the tanh operands could be bf16 to halve EUP occupancy.
    z = jnp.tanh(f) * (0.5 * (1.0 + jnp.tanh(0.5 * g)))       # (C_dil, t_tile) f32
    z_mm = z.astype(wrs_ref.dtype)

    # Fused residual_conv + skip_conv (both 1x1): one matmul, split rows after.
    rs = jnp.dot(wrs_ref[...], z_mm, preferred_element_type=jnp.float32)
    if use_bias:
        rs = rs + brs_ref[...]

    # Residual add: last tap rows of the stacked operand are exactly x[:, pad:].
    # Keep the residual stream add in f32 (bf16 only on the matmul operands).
    x_last_tap = x_stk[kc_res - c_res:, :].astype(jnp.float32)
    xout_ref[...] = (x_last_tap + rs[:c_res, :]).astype(xout_ref.dtype)

    # Skip output: only tiles overlapping the last `output_length` columns matter;
    # others are left unwritten and sliced off in the wrapper.
    @pl.when((ti + 1) * t_tile > skip_lo)
    def _():
        skip_ref[...] = rs[c_res:, :].astype(skip_ref.dtype)


def residual_block_forward(x_ncl, params, *, dilation, kernel_size,
                           output_length, use_bias=True, time_tile=512,
                           compute_dtype=jnp.bfloat16, out_dtype=None):
    """x_ncl: (B, C_res, T) PyTorch NCL layout.  Returns (x_out, skip) in NCL."""
    B, c_res, T = x_ncl.shape
    K = kernel_size
    pad = dilation * (K - 1)
    t_out = T - pad
    assert t_out > 0 and 0 < output_length <= t_out
    if out_dtype is None:
        out_dtype = compute_dtype

    c_dil = params["filter_w"].shape[0]
    c_skip = params["skip_w"].shape[0]

    # ---- time (lane) tiling: lane-dense, 128-multiple tiles -------------------
    t_tile = _round_up(min(time_tile, _round_up(t_out, 128)), 128)
    n_t = (t_out + t_tile - 1) // t_tile
    t_out_pad = n_t * t_tile

    # ---- pre-shift the K conv taps onto sublanes: (B, K*C_res, t_out_pad) -----
    # Row k*C_res + c holds x[:, c, k*dilation + t]; tap K-1 == x[:, :, pad:].
    taps = [x_ncl[:, :, k * dilation: k * dilation + t_out] for k in range(K)]
    x_stk = jnp.concatenate(taps, axis=1)
    x_stk = jnp.pad(x_stk, ((0, 0), (0, 0), (0, t_out_pad - t_out)))

    # ---- fused weights ---------------------------------------------------------
    # Conv1d weight is (C_out, C_in, K).  Fused filter+gate -> (2*C_dil, K*C_res)
    # so column block k matches tap-k rows of x_stk.
    w_fg = jnp.concatenate([params["filter_w"], params["gate_w"]], axis=0)
    w_fg = jnp.transpose(w_fg, (0, 2, 1)).reshape(2 * c_dil, K * c_res)
    w_fg = w_fg.astype(compute_dtype)
    # Fused residual+skip 1x1 weights -> (C_res + C_skip, C_dil).
    w_rs = jnp.concatenate([params["residual_w"][:, :, 0],
                            params["skip_w"][:, :, 0]], axis=0).astype(compute_dtype)

    if use_bias:
        b_fg = jnp.concatenate(
            [params["filter_b"], params["gate_b"]])[:, None].astype(jnp.float32)
        b_rs = jnp.concatenate(
            [params["residual_b"], params["skip_b"]])[:, None].astype(jnp.float32)
    else:
        b_fg = jnp.zeros((2 * c_dil, 1), jnp.float32)
        b_rs = jnp.zeros((c_res + c_skip, 1), jnp.float32)

    kernel = functools.partial(
        _residual_block_kernel,
        skip_lo=t_out - output_length,
        use_bias=use_bias,
    )

    # TODO(synk): if t_out >> output_length, write skip only for the overlapping
    # tiles' columns instead of the full padded time axis to save skip writeback.
    x_out_pad, skip_pad = pl.pallas_call(
        kernel,
        out_shape=(
            jax.ShapeDtypeStruct((B, c_res, t_out_pad), out_dtype),
            jax.ShapeDtypeStruct((B, c_skip, t_out_pad), out_dtype),
        ),
        grid_spec=pltpu.PrefetchScalarGridSpec(
            num_scalar_prefetch=0,
            grid=(B, n_t),
            in_specs=[
                pl.BlockSpec((None, K * c_res, t_tile), lambda b, t: (b, 0, t)),
                pl.BlockSpec((2 * c_dil, K * c_res), lambda b, t: (0, 0)),
                pl.BlockSpec((2 * c_dil, 1), lambda b, t: (0, 0)),
                pl.BlockSpec((c_res + c_skip, c_dil), lambda b, t: (0, 0)),
                pl.BlockSpec((c_res + c_skip, 1), lambda b, t: (0, 0)),
            ],
            out_specs=[
                pl.BlockSpec((None, c_res, t_tile), lambda b, t: (b, 0, t)),
                pl.BlockSpec((None, c_skip, t_tile), lambda b, t: (b, 0, t)),
            ],
        ),
        compiler_params=pltpu.CompilerParams(
            dimension_semantics=("parallel", "parallel"),
            vmem_limit_bytes=48 * 1024 * 1024),
    )(x_stk, w_fg, b_fg, w_rs, b_rs)

    # Slice off lane padding (and the skip columns outside the output window).
    x_out = x_out_pad[:, :, :t_out]
    skip = skip_pad[:, :, t_out - output_length:t_out]
    return x_out, skip


def _reference_forward(x, p, dilation, kernel_size, output_length):
    """Pure-JAX reference mirroring the PyTorch module (NCL layout, f32)."""
    def dconv(x, w, b):
        K = w.shape[2]
        t_out = x.shape[2] - dilation * (K - 1)
        y = jnp.zeros((x.shape[0], w.shape[0], t_out), jnp.float32)
        for k in range(K):
            xs = x[:, :, k * dilation: k * dilation + t_out]
            y = y + jnp.einsum("bct,oc->bot", xs, w[:, :, k])
        return y + b[None, :, None]

    f = jnp.tanh(dconv(x, p["filter_w"], p["filter_b"]))
    g = jax.nn.sigmoid(dconv(x, p["gate_w"], p["gate_b"]))
    z = f * g
    residual = jnp.einsum("bct,oc->bot", z, p["residual_w"][:, :, 0]) \
        + p["residual_b"][None, :, None]
    x_out = x[:, :, dilation * (kernel_size - 1):] + residual
    z_s = z[:, :, -output_length:]
    skip = jnp.einsum("bct,oc->bot", z_s, p["skip_w"][:, :, 0]) \
        + p["skip_b"][None, :, None]
    return x_out, skip


if __name__ == "__main__":
    # Module hyper-params (small, consistent with a WaveNet residual block).
    dilation = 2
    kernel_size = 2
    residual_channels = 8
    dilation_channels = 8
    skip_channels = 16
    bias = True

    B, T = 2, 16
    output_length = 8  # <= T - dilation*(kernel_size-1) = 14

    key = jax.random.PRNGKey(0)
    ks = jax.random.split(key, 9)
    params = {
        "filter_w": 0.1 * jax.random.normal(
            ks[0], (dilation_channels, residual_channels, kernel_size), jnp.float32),
        "filter_b": 0.1 * jax.random.normal(ks[1], (dilation_channels,), jnp.float32),
        "gate_w": 0.1 * jax.random.normal(
            ks[2], (dilation_channels, residual_channels, kernel_size), jnp.float32),
        "gate_b": 0.1 * jax.random.normal(ks[3], (dilation_channels,), jnp.float32),
        "residual_w": 0.1 * jax.random.normal(
            ks[4], (residual_channels, dilation_channels, 1), jnp.float32),
        "residual_b": 0.1 * jax.random.normal(ks[5], (residual_channels,), jnp.float32),
        "skip_w": 0.1 * jax.random.normal(
            ks[6], (skip_channels, dilation_channels, 1), jnp.float32),
        "skip_b": 0.1 * jax.random.normal(ks[7], (skip_channels,), jnp.float32),
    }
    x = jax.random.normal(ks[8], (B, residual_channels, T), jnp.float32)

    x_ref, skip_ref = _reference_forward(x, params, dilation, kernel_size,
                                         output_length)

    # 1) f32 compute path: tight semantic check.
    x_out32, skip32 = residual_block_forward(
        x, params, dilation=dilation, kernel_size=kernel_size,
        output_length=output_length, use_bias=bias, compute_dtype=jnp.float32)
    jax.block_until_ready((x_out32, skip32))
    assert x_out32.shape == (B, residual_channels, T - dilation * (kernel_size - 1))
    assert skip32.shape == (B, skip_channels, output_length)
    assert jnp.allclose(x_out32, x_ref, atol=1e-4, rtol=1e-4)
    assert jnp.allclose(skip32, skip_ref, atol=1e-4, rtol=1e-4)

    # 2) bf16 matmul + bf16 output path (performance default): looser tolerance.
    x_out, skip = residual_block_forward(
        x, params, dilation=dilation, kernel_size=kernel_size,
        output_length=output_length, use_bias=bias, compute_dtype=jnp.bfloat16)
    jax.block_until_ready((x_out, skip))
    assert x_out.shape == (B, residual_channels, T - dilation * (kernel_size - 1))
    assert skip.shape == (B, skip_channels, output_length)
    assert jnp.allclose(x_out.astype(jnp.float32), x_ref, atol=5e-2, rtol=5e-2)
    assert jnp.allclose(skip.astype(jnp.float32), skip_ref, atol=5e-2, rtol=5e-2)

    print("KERNEL_OK")
</pallas_src>

<mosaic_0001>
module attributes {stable_mosaic.version = 11 : i64} {
  func.func @_residual_block_kernel(%arg0: i32, %arg1: i32, %arg2: memref<1x16x128xf32, #tpu.memory_space<vmem>>, %arg3: memref<16x16xf32, #tpu.memory_space<vmem>>, %arg4: memref<16x1xf32, #tpu.memory_space<vmem>>, %arg5: memref<24x8xf32, #tpu.memory_space<vmem>>, %arg6: memref<24x1xf32, #tpu.memory_space<vmem>>, %arg7: memref<1x8x128xf32, #tpu.memory_space<vmem>>, %arg8: memref<1x16x128xf32, #tpu.memory_space<vmem>>) attributes {dimension_semantics = [#tpu.dimension_semantics<parallel>, #tpu.dimension_semantics<parallel>], iteration_bounds = array<i64: 2, 1>, scalar_prefetch = 0 : i64, scratch_operands = 0 : i64, tpu.core_type = #tpu.core_type<tc>, window_params = [{transform_indices = @transform_0, window_bounds = array<i64: 1, 16, 128>}, {pipeline_mode = #tpu.pipeline_mode<synchronous>, transform_indices = @transform_1, window_bounds = array<i64: 16, 16>}, {pipeline_mode = #tpu.pipeline_mode<synchronous>, transform_indices = @transform_2, window_bounds = array<i64: 16, 1>}, {pipeline_mode = #tpu.pipeline_mode<synchronous>, transform_indices = @transform_3, window_bounds = array<i64: 24, 8>}, {pipeline_mode = #tpu.pipeline_mode<synchronous>, transform_indices = @transform_4, window_bounds = array<i64: 24, 1>}, {transform_indices = @transform_5, window_bounds = array<i64: 1, 8, 128>}, {transform_indices = @transform_6, window_bounds = array<i64: 1, 16, 128>}]} {
    %c0 = arith.constant 0 : index
    %c0_0 = arith.constant 0 : index
    %c0_1 = arith.constant 0 : index
    %0 = vector.load %arg2[%c0, %c0_0, %c0_1] : memref<1x16x128xf32, #tpu.memory_space<vmem>>, vector<1x16x128xf32>
    %1 = vector.shape_cast %0 : vector<1x16x128xf32> to vector<16x128xf32>
    %c0_2 = arith.constant 0 : index
    %c0_3 = arith.constant 0 : index
    %2 = vector.load %arg3[%c0_2, %c0_3] : memref<16x16xf32, #tpu.memory_space<vmem>>, vector<16x16xf32>
    %cst = arith.constant dense<0.000000e+00> : vector<16x128xf32>
    %3 = tpu.matmul %2, %1, %cst {dimension_numbers = #tpu.dot_dimension_numbers<[1], [0], [0], [1], [0, 0, 1, 1], [], []>} : vector<16x16xf32>, vector<16x128xf32>, vector<16x128xf32> -> vector<16x128xf32>
    %c0_4 = arith.constant 0 : index
    %c0_5 = arith.constant 0 : index
    %4 = vector.load %arg4[%c0_4, %c0_5] : memref<16x1xf32, #tpu.memory_space<vmem>>, vector<16x1xf32>
    %5 = vector.broadcast %4 : vector<16x1xf32> to vector<16x128xf32>
    %6 = arith.addf %3, %5 : vector<16x128xf32>
    %7 = vector.extract_strided_slice %6 {offsets = [0, 0], sizes = [8, 128], strides = [1, 1]} : vector<16x128xf32> to vector<8x128xf32>
    %8 = vector.extract_strided_slice %6 {offsets = [8, 0], sizes = [8, 128], strides = [1, 1]} : vector<16x128xf32> to vector<8x128xf32>
    %9 = math.tanh %7 : vector<8x128xf32>
    %cst_6 = arith.constant 5.000000e-01 : f32
    %10 = vector.broadcast %cst_6 : f32 to vector<8x128xf32>
    %11 = arith.mulf %10, %8 : vector<8x128xf32>
    %12 = math.tanh %11 : vector<8x128xf32>
    %cst_7 = arith.constant 1.000000e+00 : f32
    %13 = vector.broadcast %cst_7 : f32 to vector<8x128xf32>
    %14 = arith.addf %13, %12 : vector<8x128xf32>
    %cst_8 = arith.constant 5.000000e-01 : f32
    %15 = vector.broadcast %cst_8 : f32 to vector<8x128xf32>
    %16 = arith.mulf %15, %14 : vector<8x128xf32>
    %17 = arith.mulf %9, %16 : vector<8x128xf32>
    %c0_9 = arith.constant 0 : index
    %c0_10 = arith.constant 0 : index
    %18 = vector.load %arg5[%c0_9, %c0_10] : memref<24x8xf32, #tpu.memory_space<vmem>>, vector<24x8xf32>
    %cst_11 = arith.constant dense<0.000000e+00> : vector<24x128xf32>
    %19 = tpu.matmul %18, %17, %cst_11 {dimension_numbers = #tpu.dot_dimension_numbers<[1], [0], [0], [1], [0, 0, 1, 1], [], []>} : vector<24x8xf32>, vector<8x128xf32>, vector<24x128xf32> -> vector<24x128xf32>
    %c0_12 = arith.constant 0 : index
    %c0_13 = arith.constant 0 : index
    %20 = vector.load %arg6[%c0_12, %c0_13] : memref<24x1xf32, #tpu.memory_space<vmem>>, vector<24x1xf32>
    %21 = vector.broadcast %20 : vector<24x1xf32> to vector<24x128xf32>
    %22 = arith.addf %19, %21 : vector<24x128xf32>
    %23 = vector.extract_strided_slice %1 {offsets = [8, 0], sizes = [8, 128], strides = [1, 1]} : vector<16x128xf32> to vector<8x128xf32>
    %24 = vector.extract_strided_slice %22 {offsets = [0, 0], sizes = [8, 128], strides = [1, 1]} : vector<24x128xf32> to vector<8x128xf32>
    %25 = arith.addf %23, %24 : vector<8x128xf32>
    %c0_14 = arith.constant 0 : index
    %c0_15 = arith.constant 0 : index
    %c0_16 = arith.constant 0 : index
    %26 = vector.load %arg7[%c0_14, %c0_15, %c0_16] : memref<1x8x128xf32, #tpu.memory_space<vmem>>, vector<1x8x128xf32>
    %27 = vector.shape_cast %26 : vector<1x8x128xf32> to vector<8x128xf32>
    %28 = vector.shape_cast %25 : vector<8x128xf32> to vector<1x8x128xf32>
    tpu.vector_store %arg7[%c0_14, %c0_15, %c0_16], %28 {strides = array<i32>} : memref<1x8x128xf32, #tpu.memory_space<vmem>>, vector<1x8x128xf32>,
    %c1_i32 = arith.constant 1 : i32
    %29 = arith.addi %arg1, %c1_i32 : i32
    %c128_i32 = arith.constant 128 : i32
    %30 = arith.muli %29, %c128_i32 : i32
    %c6_i32 = arith.constant 6 : i32
    %31 = arith.cmpi sgt, %30, %c6_i32 : i32
    %32 = arith.extui %31 : i1 to i32
    %c0_i32 = arith.constant 0 : i32
    %33 = arith.cmpi ne, %32, %c0_i32 : i32
    scf.if %33 {
      %34 = vector.extract_strided_slice %22 {offsets = [8, 0], sizes = [16, 128], strides = [1, 1]} : vector<24x128xf32> to vector<16x128xf32>
      %c0_17 = arith.constant 0 : index
      %c0_18 = arith.constant 0 : index
      %c0_19 = arith.constant 0 : index
      %35 = vector.load %arg8[%c0_17, %c0_18, %c0_19] : memref<1x16x128xf32, #tpu.memory_space<vmem>>, vector<1x16x128xf32>
      %36 = vector.shape_cast %35 : vector<1x16x128xf32> to vector<16x128xf32>
      %37 = vector.shape_cast %34 : vector<16x128xf32> to vector<1x16x128xf32>
      tpu.vector_store %arg8[%c0_17, %c0_18, %c0_19], %37 {strides = array<i32>} : memref<1x16x128xf32, #tpu.memory_space<vmem>>, vector<1x16x128xf32>,
    } else {
    }
    return
  }
  func.func @transform_0(%arg0: i32, %arg1: i32) -> (i32, i32, i32) {
    %c0_i32 = arith.constant 0 : i32
    %c0_i32_0 = arith.constant 0 : i32
    return %arg0, %c0_i32, %arg1 : i32, i32, i32
  }
  func.func @transform_1(%arg0: i32, %arg1: i32) -> (i32, i32) {
    %c0_i32 = arith.constant 0 : i32
    %c0_i32_0 = arith.constant 0 : i32
    %c0_i32_1 = arith.constant 0 : i32
    return %c0_i32, %c0_i32_0 : i32, i32
  }
  func.func @transform_2(%arg0: i32, %arg1: i32) -> (i32, i32) {
    %c0_i32 = arith.constant 0 : i32
    %c0_i32_0 = arith.constant 0 : i32
    %c0_i32_1 = arith.constant 0 : i32
    return %c0_i32, %c0_i32_0 : i32, i32
  }
  func.func @transform_3(%arg0: i32, %arg1: i32) -> (i32, i32) {
    %c0_i32 = arith.constant 0 : i32
    %c0_i32_0 = arith.constant 0 : i32
    %c0_i32_1 = arith.constant 0 : i32
    return %c0_i32, %c0_i32_0 : i32, i32
  }
  func.func @transform_4(%arg0: i32, %arg1: i32) -> (i32, i32) {
    %c0_i32 = arith.constant 0 : i32
    %c0_i32_0 = arith.constant 0 : i32
    %c0_i32_1 = arith.constant 0 : i32
    return %c0_i32, %c0_i32_0 : i32, i32
  }
  func.func @transform_5(%arg0: i32, %arg1: i32) -> (i32, i32, i32) {
    %c0_i32 = arith.constant 0 : i32
    %c0_i32_0 = arith.constant 0 : i32
    return %arg0, %c0_i32, %arg1 : i32, i32, i32
  }
  func.func @transform_6(%arg0: i32, %arg1: i32) -> (i32, i32, i32) {
    %c0_i32 = arith.constant 0 : i32
    %c0_i32_0 = arith.constant 0 : i32
    return %arg0, %c0_i32, %arg1 : i32, i32, i32
  }
}

</mosaic_0001>

<bundles_post_ra>
// kernel: tpu_custom_call.1
= control target key start
LH: loop header
LB: loop body
LE: loop exit
PB: predicated region body
PF: predicated region fallthrough
CT: control target
= control target key end

     0   :  { %12 = vsyncpa [#allocation3], 0  ;;  %s1129_s0 = inlined_call_operand.vmem [shape: f32[2,16,128], index: 0, kind: input, shape index: {}]   ;;  %s1130_s1 = inlined_call_operand.vmem [shape: f32[16,16], index: 1, kind: input, shape index: {}]   ;;  %s1131_s2 = inlined_call_operand.vmem [shape: f32[16,1], index: 2, kind: input, shape index: {}]   ;;  %s1132_s3 = inlined_call_operand.vmem [shape: f32[24,8], index: 3, kind: input, shape index: {}]   ;;  %s1133_s4 = inlined_call_operand.vmem [shape: f32[24,1], index: 4, kind: input, shape index: {}]   ;;  %s1134_s5 = inlined_call_operand.hbm [shape: f32[2,8,128], index: 5, kind: output, shape index: {0}]   ;;  %s1135_s6 = inlined_call_operand.hbm [shape: f32[2,16,128], index: 6, kind: output, shape index: {1}]  }
   0x1   :  { %14 = vsyncpa [#allocation3 + $0x1], 0 }
   0x2   :  { %15 = vsyncpa [#allocation5], 0 }
   0x3   :  { %17 = vsyncpa [#allocation5 + $0x1], 0  ;;  %s936_s21 = smov 0   ;;  %s938_s22 = smov 0  }
   0x4   :  { %s940_s23 = smov 0   ;;  %s942_s24 = smov 0  }
   0x5   :  { %s944_s25 = smov 0   ;;  %s946_s26 = smov 0  }
   0x6 LB: > { %s658_s27 = sadd.s32 4294967295, %s892_s26   ;;  %s659_s28 = sadd.s32 4294967294, %s892_s26   ;;  %s892_s26 = sphi %s946_s26, %s23_s26   ;;  %s888_s25 = sphi %s944_s25, %s1143_s25   ;;  %s884_s24 = sphi %s942_s24, %s1142_s24   ;;  %s880_s23 = sphi %s940_s23, %s1141_s23   ;;  %s876_s22 = sphi %s938_s22, %s1140_s22   ;;  %s872_s21 = sphi %s936_s21, %s1139_s21  }
   0x7   : > { %s35_s29 = sadd.s32 1, %s888_s25  ;;  %s156_s30 = sadd.s32 1, %s880_s23 }
   0x8   : > { %p37_p0 = scmp.ge.s32.totalorder %s35_s29, 2  ;;  %p166_p1 = scmp.ne.s32.totalorder %s880_s23, %s876_s22 }
   0x9   : > { %p167_p2 = scmp.eq.s32.totalorder %s658_s27, 1  ;;  %p172_p3 = scmp.ne.s32.totalorder %s876_s22, %s872_s21 }
   0xa   : > { %s1145_s29 = smov (%p37_p0, %s35_s29), 0  ;;  %p173_p5 = scmp.eq.s32.totalorder %s659_s28, 1 }
   0xb   : > { %p976_p4 = por %p167_p2, %p166_p1  ;;  %s151_s8 = ssub.s32 %s888_s25, %s1145_s29 }
   0xc   : > { %p662_p6 = scmp.ge.s32.totalorder %s892_s26, 1  ;;  %p154_p7 = scmp.eq.s32.totalorder %s151_s8, 0 }
   0xd   : > { %p983_p8 = por %p173_p5, %p172_p3  ;;  %p242_p9 = scmp.lt.s32.totalorder %s892_s26, 3 }
   0xe   : > { %s989_s10 = scalar_select %p154_p7, %s880_s23, %s156_s30  }
   0xf   : > { %p243_p10 = pnand %p662_p6, %p242_p9 }
  0x10   : > { %p280_p11 = scmp.lt.s32.totalorder (!%p243_p10), %s884_s24, 1  ;;  %v290_v0 = vld [vmem:[%s1130_s1] sm:$0xff] (!%p243_p10)  ;;  %vm304_vm0 = vcmask (!%p243_p10), 130048   ;;  %v293_v1 = vld [vmem:[%s1131_s2 + $0x8] sm:$0xff] (!%p243_p10)  ;;  %v894_v2 = vmov (!%p243_p10), 0   ;;  %v397_v7 = vld [vmem:[%s1133_s4 + $0x10] sm:$0xff] (!%p243_p10) }
  0x11   : > { %246 = sbr.rel (%p243_p10) target bundleno = 524 (0x20c), region = 40  ;;  %693 = vmatprep.mubr.msk.f32.mxu0 (!%p243_p10), %vm304_vm0, %v290_v0  ;;  %776 = vset.pattern.permute.xlu0 (!%p243_p10), %v894_v2  ;;  %v292_v3 = vld [vmem:[%s1131_s2] sm:$0xff] (!%p243_p10)  ;;  %v291_v8 = vld [vmem:[%s1130_s1 + $0x8] sm:$0xff] (!%p243_p10)  ;;  %v895_v9 = vmov (!%p243_p10), 0.0   ;;  %vm896_vm1 = vmmov (!%p243_p10), 0   ;;  %vm413_vm2 = vcmask (!%p243_p10), 64512  }
  0x12   : > { %301 = vperm.xlu0 (!%p243_p10), %776, %v293_v1   ;;  %777 = vset.pattern.permute.xlu1 (!%p243_p10), %v894_v2  ;;  %v395_v10 = vld [vmem:[%s1133_s4] sm:$0xff] (!%p243_p10)  ;;  %v396_v11 = vld [vmem:[%s1133_s4 + $0x8] sm:$0xff] (!%p243_p10)  ;;  %v394_v26 = vld [vmem:[%s1132_s3 + $0x10] sm:$0xff] (!%p243_p10)  ;;  %s1032_s28 = sand.u32 (!%p243_p10), 1, %s876_s22   ;;  %s674_s11 = sshll.u32 (!%p243_p10), %s884_s24, 7 }
  0x13   : > { %696 = vmatprep.subr.mxu1 (!%p243_p10), %v895_v9  ;;  %698 = vmatprep.mubr.msk.f32.mxu1 (!%p243_p10), %vm896_vm1, %v895_v9  ;;  %v392_v24 = vld [vmem:[%s1132_s3] sm:$0xff] (!%p243_p10)  ;;  %v393_v25 = vld [vmem:[%s1132_s3 + $0x8] sm:$0xff] (!%p243_p10)  ;;  %s663_s30 = sshll.u32 (!%p243_p10), %s1032_s28, 3  ;;  %s664_s8 = sshll.u32 (!%p243_p10), %s1032_s28, 4 }
  0x14   : > { %400 = vperm.xlu1 (!%p243_p10), %777, %v395_v10   ;;  %s272_s12 = scalar_lea.vmem (!%p243_p10), [#allocation2], %s663_s30  ;;  %s1040_s16 = scalar_lea.hbm (!%p243_p10), %s1134_s5, %s674_s11 }
  0x15   : > { %s533_s13 = sshll.u32 (!%p243_p10), %s272_s12, 4  ;;  %s1044_s17 = scalar_lea.vmem (!%p243_p10), [#allocation4], %s664_s8  ;;  %s1042_s13 = int_to_ptr.vmem [resolvable:$true] %s533_s13 }
  0x16   : > { %296 = vperm.xlu0 (!%p243_p10), %776, %v292_v3   ;;  %s514_s20 = scalar_lea.sflag (!%p243_p10), [#allocation3], %s1032_s28  ;;  %s897_s30 = smov (!%p243_p10), [#allocation2]  }
  0x17   : > { %s786_s11 = sshll.u32 (!%p243_p10), %s897_s30, 4  ;;  %s787_s11 = int_to_ptr.vmem [resolvable:$false] %s786_s11 }
  0x18   : > { %s281_s15 = scalar_select %p280_p11, %s884_s24, 1  ;;  %405 = vperm.xlu1 %777, %v396_v11  }
  0x19   : > { %s788_s14 = scalar_lea.vmem %s787_s11, 256  ;;  %p789_p1 = scmp.lt.s32.totalorder %s1042_s13, %s787_s11 }
  0x1a   : > { %s679_s18 = sshll.u32 %s281_s15, 4  ;;  %410 = vperm.xlu0 %776, %v397_v7  }
  0x1b   : > { %s287_s27 = scalar_lea.vmem %s1129_s0, %s679_s18  ;;  %s547_s18 = sshll.u32 %s1044_s17, 4  ;;  %s1073_s18 = int_to_ptr.vmem [resolvable:$true] %s547_s18 }
  0x1c   : > { %v288_v4 = vld [vmem:[%s287_s27] sm:$0xff]  ;;  %v289_v5 = vld [vmem:[%s287_s27 + $0x8] sm:$0xff]  ;;  %s782_s27 = scalar_lea.vmem %s1042_s13, 128 }
  0x1d   : > { %v707_v6 = vpack.c.bf16 %v289_v5, %v288_v4  ;;  %p783_p12 = scmp.ne.s32.totalorder %s1042_s13, %s782_s27  ;;  %p790_p2 = scmp.lt.s32.totalorder %s788_s14, %s782_s27 }
  0x1f   : > { %708 = vmatprep.subr.bf16.mxu0 %v707_v6  ;;  %p784_p13 = pnand %p783_p12, %p976_p4  ;;  %p791_p3 = por %p790_p2, %p789_p1 }
  0x20   : > { %710 = vmatpush3.bf16.msra.mxu0 %v707_v6 }
  0x21   : > { %p785_p0 = pneg %p784_p13 }
  0x23   : > { %694 = vmatmul.mubr.msk.f32.vlgmr.msra.gmra.mrb[0].mxu0 %vm304_vm0, %v291_v8  ;;  %p792_p5 = pnand %p791_p3, %p785_p0 }
  0x91   : > { %v302_v12 = vpop.permute.xlu0 %301 }
  0x93   : > { %v401_v27 = vpop.permute.xlu1 %400 }
  0x95   : > { %v297_v17 = vpop.permute.xlu0 %296 }
  0x97   : > { %v406_v31 = vpop.permute.xlu1 %405 }
  0xf6   : > { %v695_v13 = vpop.f32.mrb[0].mxu0 }
  0xf7   : > { %v383_v14 = vadd.f32 %v695_v13, %v302_v12  ;;  %v377_v15 = vpop.f32.mrb[1].mxu0 }
  0xf8   : > { %v378_v18 = vadd.f32 %v377_v15, %v297_v17 }
  0xf9   : > { %v387_v16 = vmul.f32 0.5, %v383_v14 }
  0xfb   : > { %778 = vtanh.f32 %v387_v16 }
  0xfc   : > { %780 = vtanh.f32 %v378_v18 }
 0x105   : > { %v779_v19 = vpop.eup %778 }
 0x106   : > { %v389_v20 = vadd.f32 1.0, %v779_v19  ;;  %v781_v22 = vpop.eup %780 }
 0x108   : > { %v390_v21 = vmul.f32 0.5, %v389_v20 }
 0x10a   : > { %v391_v23 = vmul.f32 %v781_v22, %v390_v21 }
 0x10c   : > { %697 = vmatpush3.msra.mxu1 %v391_v23 }
 0x10d   : > { %699 = vmatmul.mubr.msk.f32.vlgmr.msra.gmra.mrb[0].mxu1 %vm413_vm2, %v392_v24 }
 0x10e   : > { %701 = vmatprep.mubr.msk.f32.mxu1 %vm896_vm1, %v895_v9 }
 0x111   : > { %702 = vmatmul.mubr.msk.f32.gmra.mrb[2].mxu1 %vm413_vm2, %v393_v25 }
 0x112   : > { %704 = vmatprep.mubr.msk.f32.mxu1 %vm896_vm1, %v895_v9 }
 0x115   : > { %705 = vmatmul.mubr.msk.f32.gmra.mrb[4].mxu1 %vm413_vm2, %v394_v26 }
 0x1e0   : > { %v489_v28 = vpop.f32.mrb[0].mxu1 }
 0x1e1   : > { %v490_v29 = vadd.f32 %v489_v28, %v401_v27  ;;  %v700_v30 = vpop.f32.mrb[1].mxu1 }
 0x1e3   : > { %v503_v32 = vadd.f32 %v490_v29, %v289_v5 }
 0x1e4   : > { %v494_v33 = vpop.f32.mrb[2].mxu1 }
 0x1e5   : > { %v495_v34 = vadd.f32 %v494_v33, %v406_v31  ;;  %v703_v35 = vpop.f32.mrb[3].mxu1  ;;  %504 = vst [vmem:[%s272_s12] sm:$0xff] %v503_v32 }
 0x1e6   : > { %795 = shalt.err (!%p792_p5)
}
 0x1e7   : > { %s796_s8 = scalar_lea.hbm %s1040_s16, 128  ;;  %s800_s30 = scalar_lea.hbm %s1134_s5, 256 }
 0x1e8   : > { %p797_p6 = scmp.ne.s32.totalorder %s1040_s16, %s796_s8  ;;  %p801_p10 = scmp.lt.u32.totalorder %s1040_s16, %s1134_s5 }
 0x1e9   : > { %p802_p11 = scmp.lt.u32.totalorder %s800_s30, %s796_s8  ;;  %p804_p13 = scmp.lt.u32.totalorder %s796_s8, %s1040_s16 }
 0x1ea   : > { %p798_p7 = pnand %p797_p6, %p976_p4 }
 0x1eb   : > { %p803_p12 = por %p802_p11, %p801_p10 }
 0x1ec   : > { %p799_p9 = pneg %p798_p7 }
 0x1ed   : > { %p805_p0 = por %p804_p13, %p803_p12 }
 0x1ef   : > { %p806_p1 = pnand %p805_p0, %p799_p9 }
 0x1f1   : > { %809 = shalt.err (!%p806_p1)
}
 0x1f2   : > { %711 = dma.vmem_to_hbm [thread:$0]  (%p976_p4), %s1042_s13, 128, %s1040_s16, %s514_s20   ;;  %511 = vst [vmem:[%s1044_s17] sm:$0xff] %v495_v34  ;;  %v411_v36 = vpop.permute.xlu0 %410  ;;  %v499_v37 = vpop.f32.mrb[4].mxu1 }
 0x1f3   : > { %v500_v38 = vadd.f32 %v499_v37, %v411_v36  ;;  %v706_v39 = vpop.f32.mrb[5].mxu1  ;;  %s1138_s19 = sshll.u32 %s884_s24, 8  ;;  %s519_s12 = scalar_lea.sflag [#allocation5], %s1032_s28 }
 0x1f4   : > { %s1080_s8 = scalar_lea.hbm %s1135_s6, %s1138_s19  ;;  %s810_s13 = scalar_lea.vmem %s1073_s18, 256 }
 0x1f5   : > { %512 = vst [vmem:[%s1044_s17 + $0x8] sm:$0xff] %v500_v38  ;;  %p811_p2 = scmp.ne.s32.totalorder %s1073_s18, %s810_s13  ;;  %s898_s16 = smov [#allocation4]  }
 0x1f6   : > { %s814_s20 = sshll.u32 %s898_s16, 4  ;;  %s815_s20 = int_to_ptr.vmem [resolvable:$false] %s814_s20 }
 0x1f7   : > { %p812_p3 = pnand %p811_p2, %p976_p4  ;;  %s816_s15 = scalar_lea.vmem %s815_s20, 512 }
 0x1f8   : > { %p817_p6 = scmp.lt.s32.totalorder %s1073_s18, %s815_s20  ;;  %p818_p7 = scmp.lt.s32.totalorder %s816_s15, %s810_s13 }
 0x1f9   : > { %p813_p5 = pneg %p812_p3 }
 0x1fa   : > { %p819_p9 = por %p818_p7, %p817_p6 }
 0x1fc   : > { %p820_p10 = pnand %p819_p9, %p813_p5 }
 0x1fe   : > { %823 = shalt.err (!%p820_p10)
}
 0x1ff   : > { %s824_s24 = scalar_lea.hbm %s1080_s8, 256  ;;  %s828_s11 = scalar_lea.hbm %s1135_s6, 512 }
 0x200   : > { %p825_p11 = scmp.ne.s32.totalorder %s1080_s8, %s824_s24  ;;  %p829_p0 = scmp.lt.u32.totalorder %s1080_s8, %s1135_s6 }
 0x201   : > { %p830_p1 = scmp.lt.u32.totalorder %s828_s11, %s824_s24  ;;  %p832_p3 = scmp.lt.u32.totalorder %s824_s24, %s1080_s8 }
 0x202   : > { %p826_p12 = pnand %p825_p11, %p976_p4 }
 0x203   : > { %p831_p2 = por %p830_p1, %p829_p0 }
 0x204   : > { %p827_p13 = pneg %p826_p12 }
 0x205   : > { %p833_p5 = por %p832_p3, %p831_p2 }
 0x207   : > { %p834_p6 = pnand %p833_p5, %p827_p13 }
 0x209   : > { %837 = shalt.err (!%p834_p6)
}
 0x20a   : > { %s899_s14 = smov 128   ;;  %s900_s13 = smov 8  }
 0x20b   : > { %712 = dma.vmem_to_hbm [thread:$0]  (%p976_p4), %s1073_s18, 256, %s1080_s8, %s519_s12, %s899_s14, %s899_s14, %s900_s13  }
 0x20c PF: > { %p722_p7 = scmp.ge.s32.totalorder %s892_s26, 2  ;;  %s562_s16 = sand.u32 1, %s872_s21  }
 0x20d   : > { %s563_s20 = scalar_lea.sflag [#allocation3], %s562_s16 }
 0x20e   : > { %p716_p9 = pnand %p722_p7, %p983_p8 }
 0x210   : > { %863 = dma.done.wait (!%p716_p9), %s563_s20, 128  }
 0x211   : > { %865 = vsyncadd (!%p716_p9), %s563_s20, 4294967168  ;;  %s572_s15 = scalar_lea.sflag [#allocation5], %s562_s16 }
 0x212   : > { %867 = dma.done.wait (!%p716_p9), %s572_s15, 256  }
 0x213   : > { %869 = vsyncadd (!%p716_p9), %s572_s15, 4294967040  ;;  %s23_s26 = sadd.s32 1, %s892_s26   ;;  %s1139_s21 = smov %s876_s22 }
 0x214   : > { %p20_p10 = scmp.ge.s32.totalorder %s23_s26, 4   ;;  %s1140_s22 = smov %s880_s23 }
 0x215   : > { %s1141_s23 = smov %s989_s10  ;;  %s1142_s24 = smov %s888_s25 }
 0x216   : > { %s1143_s25 = smov %s1145_s29  ;;  %22 = sbr.rel (!%p20_p10) target bundleno = 6 (0x6), region = 96 }
 0x21d   :  { %577 = vsyncpa [#allocation3], 1 }
 0x21e   :  { %579 = vsyncpa [#allocation3 + $0x1], 1 }
 0x21f   :  { %580 = vsyncpa [#allocation5], 1 }
 0x220   :  { %582 = vsyncpa [#allocation5 + $0x1], 1 }

</bundles_post_ra>
